<compile_context>
chip_gen: v6e
topology: v6e:2x2x1
jax: 0.10.0
libtpu: 0.0.40
codegen_flags: <defaults>
</compile_context>

<pallas_src>
import jax
import jax.numpy as jnp
from jax import lax
from jax.experimental import pallas as pl
from jax.experimental.pallas import tpu as pltpu


def _cdiv(a, b):
    return (a + b - 1) // b


def _round_up(x, m):
    return _cdiv(x, m) * m


# ---------------------------------------------------------------------------
# Kernels
# ---------------------------------------------------------------------------

def _dot_f32(x, w):
    """MXU matmul with f32 accumulation.

    f32 weights  -> precision=HIGHEST for parity with PyTorch f32 Linear.
    bf16 weights -> cast the activation tile to bf16 (MXU-native on v6e/v7x);
                    preferred_element_type keeps the accumulate in f32.
    """
    if w.dtype == jnp.bfloat16:
        return jnp.dot(x.astype(jnp.bfloat16), w,
                       preferred_element_type=jnp.float32)
    return jnp.dot(x, w, precision=lax.Precision.HIGHEST,
                   preferred_element_type=jnp.float32)


def _linear_single_k_kernel(x_ref, w_ref, b_ref, o_ref):
    # x_ref: [tm, Kp]   w_ref: [Kp, tn]   b_ref: [1, tn]   o_ref: [tm, tn]
    # K is one contiguous tile -> no accumulator scratch, no pl.when branches.
    o_ref[...] = (_dot_f32(x_ref[...], w_ref[...]) + b_ref[...]).astype(o_ref.dtype)


def _linear_multi_k_kernel(x_ref, w_ref, b_ref, o_ref, acc_ref):
    # Fallback when K is too large for a single VMEM tile.
    # NOTE: correctness relies on K being the LAST (innermost, "arbitrary")
    # grid axis so acc_ref persists across all K steps of one (i, j) tile.
    k = pl.program_id(2)

    @pl.when(k == 0)
    def _():
        acc_ref[...] = jnp.zeros_like(acc_ref)

    acc_ref[...] += _dot_f32(x_ref[...], w_ref[...])

    @pl.when(k == pl.num_programs(2) - 1)
    def _():
        o_ref[...] = (acc_ref[...] + b_ref[...]).astype(o_ref.dtype)


# ---------------------------------------------------------------------------
# pallas_call wrapper
# ---------------------------------------------------------------------------

def _ip_embedding_matmul(x_p, w_kn, b_row, *, tm, tn, tk):
    Mp, Kp = x_p.shape
    _, Np = w_kn.shape
    w_bytes = jnp.dtype(w_kn.dtype).itemsize
    out_bytes = jnp.dtype(x_p.dtype).itemsize
    multi_k = tk < Kp

    # Advisory cost: padded sizes, actual dtypes, x re-read per N tile,
    # weight re-read per M tile.
    flops = 2 * Mp * Kp * Np
    bytes_accessed = (Mp * Kp * out_bytes * (Np // tn)
                      + Kp * Np * w_bytes * (Mp // tm)
                      + Np * 4
                      + Mp * Np * out_bytes)

    if not multi_k:
        grid = (Mp // tm, Np // tn)
        grid_spec = pltpu.PrefetchScalarGridSpec(
            num_scalar_prefetch=0,
            grid=grid,
            in_specs=[
                pl.BlockSpec((tm, Kp), lambda i, j: (i, 0)),   # x tile
                pl.BlockSpec((Kp, tn), lambda i, j: (0, j)),   # weight [K, N]
                pl.BlockSpec((1, tn), lambda i, j: (0, j)),    # bias row
            ],
            out_specs=pl.BlockSpec((tm, tn), lambda i, j: (i, j)),
        )
        kernel = _linear_single_k_kernel
        semantics = ("parallel", "parallel")
    else:
        grid = (Mp // tm, Np // tn, Kp // tk)                  # K innermost!
        grid_spec = pltpu.PrefetchScalarGridSpec(
            num_scalar_prefetch=0,
            grid=grid,
            in_specs=[
                pl.BlockSpec((tm, tk), lambda i, j, k: (i, k)),
                pl.BlockSpec((tk, tn), lambda i, j, k: (k, j)),
                pl.BlockSpec((1, tn), lambda i, j, k: (0, j)),  # K-invariant
            ],
            out_specs=pl.BlockSpec((tm, tn), lambda i, j, k: (i, j)),
            scratch_shapes=[pltpu.VMEM((tm, tn), jnp.float32)],
        )
        kernel = _linear_multi_k_kernel
        semantics = ("parallel", "parallel", "arbitrary")

    return pl.pallas_call(
        kernel,
        out_shape=jax.ShapeDtypeStruct((Mp, Np), x_p.dtype),
        grid_spec=grid_spec,
        compiler_params=pltpu.CompilerParams(dimension_semantics=semantics),
        cost_estimate=pl.CostEstimate(
            flops=flops, transcendentals=0, bytes_accessed=bytes_accessed),
    )(x_p, w_kn, b_row)


# ---------------------------------------------------------------------------
# Public API: one-time parameter prep + forward
# ---------------------------------------------------------------------------

def make_ip_embedding(weight, bias, *, weight_dtype=jnp.float32,
                      tm_cap=256, tn_cap=1024,
                      vmem_budget_bytes=12 * 1024 * 1024):
    """One-time parameter prep for nn.Linear(input_dim, embed_dim).

    weight: [embed_dim, input_dim]  (PyTorch convention)
    bias:   [embed_dim]
    Returns forward(x) -> x @ weight.T + bias, computed by a Pallas kernel.

    weight_dtype=jnp.bfloat16 halves weight HBM traffic (the kernel is
    weight-bandwidth-bound at small batch; recommended on v6e/v7x).
    Accumulation is f32 either way.
    """
    embed_dim, input_dim = weight.shape
    Kp = _round_up(input_dim, 128)
    Np = _round_up(embed_dim, 128)

    # Done ONCE, outside the hot path: transpose to [K, N] (lane-dense in N,
    # natural MXU orientation, no in-kernel transpose) and pad to 128-multiples
    # so the forward pass never re-pads the weight.
    w_kn = jnp.pad(weight.astype(weight_dtype).T,
                   ((0, Kp - input_dim), (0, Np - embed_dim)))
    b_row = jnp.pad(bias.astype(jnp.float32),
                    (0, Np - embed_dim)).reshape(1, Np)
    w_kn = jax.block_until_ready(w_kn)
    b_row = jax.block_until_ready(b_row)
    w_bytes = jnp.dtype(weight_dtype).itemsize

    def forward(x):
        B, in_dim = x.shape
        assert in_dim == input_dim, (in_dim, input_dim)
        out_bytes = jnp.dtype(x.dtype).itemsize

        # --- M tiling: balanced so M padding never exceeds 7 rows ----------
        n_m = _cdiv(B, tm_cap)
        tm = _round_up(_cdiv(B, n_m), 8)
        Mp = _round_up(B, tm)

        def fits(tm_, tn_, tk_, multi):
            # Double-buffered input/output tiles (+ bias) + optional scratch.
            b = 2 * (tm_ * tk_ * out_bytes + tk_ * tn_ * w_bytes
                     + tm_ * tn_ * out_bytes + tn_ * 4)
            if multi:
                b += tm_ * tn_ * 4
            return b <= vmem_budget_bytes

        # --- K tiling: prefer the full padded K as one contiguous tile -----
        if fits(tm, 128, Kp, False):
            tk = Kp
        else:
            tk = 128
            for t in range(128, Kp + 1, 128):
                if Kp % t == 0 and fits(tm, 128, t, True):
                    tk = t
        multi_k = tk < Kp

        # --- N tiling: largest lane-dense divisor of Np within budget ------
        tn = 128
        for t in range(128, min(Np, tn_cap) + 1, 128):
            if Np % t == 0 and fits(tm, t, tk, multi_k):
                tn = t
        # Keep >= 2 parallel grid steps so both v7x TensorCores get work.
        if (Mp // tm) * (Np // tn) < 2 and Np // 128 >= 2:
            for t in range(tn - 128, 127, -128):
                if Np % t == 0 and Np // t >= 2:
                    tn = t
                    break

        # --- Pad only the (small) activation; slice output only if padded --
        if (Mp, Kp) != (B, in_dim):
            x_p = jnp.pad(x, ((0, Mp - B), (0, Kp - in_dim)))
        else:
            x_p = x

        out = _ip_embedding_matmul(x_p, w_kn, b_row, tm=tm, tn=tn, tk=tk)
        if (Mp, Np) != (B, embed_dim):
            out = out[:B, :embed_dim]
        return out

    return forward


# ---------------------------------------------------------------------------
# Self-test
# ---------------------------------------------------------------------------

if __name__ == "__main__":
    def run_case(B, input_dim, embed_dim, key):
        kx, kw, kb = jax.random.split(key, 3)
        # Deterministic init mimicking nn.Linear's uniform bounds.
        bound = 1.0 / jnp.sqrt(jnp.float32(input_dim))
        weight = jax.random.uniform(kw, (embed_dim, input_dim), jnp.float32,
                                    minval=-bound, maxval=bound)
        bias = jax.random.uniform(kb, (embed_dim,), jnp.float32,
                                  minval=-bound, maxval=bound)
        x = jax.random.normal(kx, (B, input_dim), jnp.float32)

        forward = make_ip_embedding(weight, bias)       # one-time param prep
        out = jax.block_until_ready(forward(x))

        ref = jnp.dot(x, weight.T, precision=lax.Precision.HIGHEST) + bias
        assert out.shape == (B, embed_dim), out.shape
        assert jnp.allclose(out, ref, atol=1e-5, rtol=1e-5), (
            float(jnp.max(jnp.abs(out - ref))))

    key = jax.random.PRNGKey(0)
    k1, k2 = jax.random.split(key)
    # Tiny demo shape consistent with the module.
    run_case(B=8, input_dim=32, embed_dim=32, key=k1)
    # Shape exercising M padding and multiple lane-dense N tiles.
    run_case(B=12, input_dim=256, embed_dim=384, key=k2)

    print("KERNEL_OK")
</pallas_src>

<mosaic_0001>
module attributes {stable_mosaic.version = 11 : i64} {
  func.func @_linear_single_k_kernel(%arg0: i32, %arg1: i32, %arg2: memref<8x128xf32, #tpu.memory_space<vmem>>, %arg3: memref<128x128xf32, #tpu.memory_space<vmem>>, %arg4: memref<1x128xf32, #tpu.memory_space<vmem>>, %arg5: memref<8x128xf32, #tpu.memory_space<vmem>>) attributes {dimension_semantics = [#tpu.dimension_semantics<parallel>, #tpu.dimension_semantics<parallel>], iteration_bounds = array<i64: 1, 1>, scalar_prefetch = 0 : i64, scratch_operands = 0 : i64, tpu.core_type = #tpu.core_type<tc>, window_params = [{transform_indices = @transform_0, window_bounds = array<i64: 8, 128>}, {transform_indices = @transform_1, window_bounds = array<i64: 128, 128>}, {transform_indices = @transform_2, window_bounds = array<i64: 1, 128>}, {transform_indices = @transform_3, window_bounds = array<i64: 8, 128>}]} {
    %c0 = arith.constant 0 : index
    %c0_0 = arith.constant 0 : index
    %0 = vector.load %arg2[%c0, %c0_0] : memref<8x128xf32, #tpu.memory_space<vmem>>, vector<8x128xf32>
    %c0_1 = arith.constant 0 : index
    %c0_2 = arith.constant 0 : index
    %1 = vector.load %arg3[%c0_1, %c0_2] : memref<128x128xf32, #tpu.memory_space<vmem>>, vector<128x128xf32>
    %cst = arith.constant dense<0.000000e+00> : vector<8x128xf32>
    %2 = tpu.matmul %0, %1, %cst {dimension_numbers = #tpu.dot_dimension_numbers<[1], [0], [0], [1], [0, 0, 1, 1], [], []>, precision = #tpu.contract_precision<fp32>} : vector<8x128xf32>, vector<128x128xf32>, vector<8x128xf32> -> vector<8x128xf32>
    %c0_3 = arith.constant 0 : index
    %c0_4 = arith.constant 0 : index
    %3 = vector.load %arg4[%c0_3, %c0_4] : memref<1x128xf32, #tpu.memory_space<vmem>>, vector<1x128xf32>
    %4 = vector.broadcast %3 : vector<1x128xf32> to vector<8x128xf32>
    %5 = arith.addf %2, %4 : vector<8x128xf32>
    %c0_5 = arith.constant 0 : index
    %c0_6 = arith.constant 0 : index
    %6 = vector.load %arg5[%c0_5, %c0_6] : memref<8x128xf32, #tpu.memory_space<vmem>>, vector<8x128xf32>
    tpu.vector_store %arg5[%c0_5, %c0_6], %5 {strides = array<i32>} : memref<8x128xf32, #tpu.memory_space<vmem>>, vector<8x128xf32>,
    return
  }
  func.func @transform_0(%arg0: i32, %arg1: i32) -> (i32, i32) {
    %c0_i32 = arith.constant 0 : i32
    %c0_i32_0 = arith.constant 0 : i32
    return %arg0, %c0_i32 : i32, i32
  }
  func.func @transform_1(%arg0: i32, %arg1: i32) -> (i32, i32) {
    %c0_i32 = arith.constant 0 : i32
    %c0_i32_0 = arith.constant 0 : i32
    return %c0_i32, %arg1 : i32, i32
  }
  func.func @transform_2(%arg0: i32, %arg1: i32) -> (i32, i32) {
    %c0_i32 = arith.constant 0 : i32
    %c0_i32_0 = arith.constant 0 : i32
    return %c0_i32, %arg1 : i32, i32
  }
  func.func @transform_3(%arg0: i32, %arg1: i32) -> (i32, i32) {
    %c0_i32 = arith.constant 0 : i32
    return %arg0, %arg1 : i32, i32
  }
}

</mosaic_0001>

<bundles_post_ra>
// kernel: tpu_custom_call.1
= control target key start
LH: loop header
LB: loop body
LE: loop exit
PB: predicated region body
PF: predicated region fallthrough
CT: control target
= control target key end

     0   :  { %8 = vsyncpa [#allocation3], 0  ;;  %s1511_s0 = inlined_call_operand.hbm [shape: f32[8,128], index: 0, kind: input, shape index: {}]   ;;  %s1512_s1 = inlined_call_operand.hbm [shape: f32[128,128], index: 1, kind: input, shape index: {}]   ;;  %s1513_s2 = inlined_call_operand.vmem [shape: f32[1,128], index: 2, kind: input, shape index: {}]   ;;  %s1514_s3 = inlined_call_operand.hbm [shape: f32[8,128], index: 3, kind: output, shape index: {}]  }
   0x1   :  { %9 = vsyncpa [#allocation6], 0 }
   0x2   :  { %10 = vsyncpa [#allocation4], 0  ;;  %s1109_s12 = smov [#allocation2]   ;;  %s1110_s14 = smov [#allocation5]  }
   0x3   :  { %s17_s13 = sshll.u32 %s1109_s12, 4  ;;  %s26_s15 = sshll.u32 %s1110_s14, 4  ;;  %s18_s13 = int_to_ptr.vmem [resolvable:$true] %s17_s13  ;;  %s27_s15 = int_to_ptr.vmem [resolvable:$true] %s26_s15 }
   0x4   :  { %s1051_s16 = scalar_lea.vmem %s18_s13, 128  ;;  %p1056_p1 = scmp.lt.s32.totalorder %s18_s13, %s18_s13 }
   0x5   :  { %p1052_p0 = scmp.ne.s32.totalorder %s18_s13, %s1051_s16  ;;  %p1057_p2 = scmp.lt.s32.totalorder %s1051_s16, %s1051_s16 }
   0x7   :  { %p1058_p3 = por %p1057_p2, %p1056_p1 }
   0x9   :  { %p1059_p4 = pnand %p1058_p3, %p1052_p0 }
   0xb   :  { %1062 = shalt.err (!%p1059_p4)
}
   0xc   :  { %20 = dma.hbm_to_vmem [thread:$0]  %s1511_s0, 128, %s18_s13, [#allocation3]  }
   0xd   :  { %s1071_s19 = scalar_lea.vmem %s27_s15, 2048  ;;  %p1076_p6 = scmp.lt.s32.totalorder %s27_s15, %s27_s15 }
   0xe   :  { %p1072_p5 = scmp.ne.s32.totalorder %s27_s15, %s1071_s19  ;;  %p1077_p7 = scmp.lt.s32.totalorder %s1071_s19, %s1071_s19 }
  0x10   :  { %p1078_p8 = por %p1077_p7, %p1076_p6 }
  0x12   :  { %p1079_p9 = pnand %p1078_p8, %p1072_p5 }
  0x14   :  { %1082 = shalt.err (!%p1079_p9)
}
  0x15   :  { %s1111_s20 = smov 128   ;;  %s1112_s21 = smov 8  }
  0x16   :  { %32 = dma.hbm_to_vmem [thread:$0]  %s1512_s1, 2048, %s27_s15, [#allocation6], %s1111_s20, %s1111_s20, %s1112_s21  }
  0x17   :  { %1103 = dma.done.wait [#allocation3], 128  }
  0x18   :  { %1104 = vsyncadd [#allocation3], 4294967168 }
  0x19   :  { %1105 = dma.done.wait [#allocation6], 2048  }
  0x1a   :  { %1106 = vsyncadd [#allocation6], 4294965248  ;;  %v1113_v0 = vmov 0.0   ;;  %vm1114_vm0 = vmmov 0   ;;  %v57_v1 = vld [vmem:[#allocation5 + $0x78] sm:$0xff]  ;;  %v56_v2 = vld [vmem:[#allocation5 + $0x70] sm:$0xff] }
  0x1b   :  { %826 = vmatprep.subr.mxu0 %v1113_v0  ;;  %861 = vmatprep.subr.mxu1 %v1113_v0  ;;  %v55_v3 = vld [vmem:[#allocation5 + $0x68] sm:$0xff]  ;;  %v1148_v4 = vand.u32 4294901760, %v57_v1  ;;  %v1150_v5 = vand.u32 4294901760, %v56_v2  ;;  %v54_v7 = vld [vmem:[#allocation5 + $0x60] sm:$0xff]  ;;  %v53_v8 = vld [vmem:[#allocation5 + $0x58] sm:$0xff]  ;;  %s1115_s24 = smov [#allocation7]  }
  0x1c   :  { %858 = vmatprep.mubr.msk.f32.mxu0 %vm1114_vm0, %v1113_v0  ;;  %893 = vmatprep.mubr.msk.f32.mxu1 %vm1114_vm0, %v1113_v0  ;;  %v1152_v6 = vand.u32 4294901760, %v55_v3  ;;  %v52_v9 = vld [vmem:[#allocation5 + $0x50] sm:$0xff]  ;;  %v1154_v10 = vand.u32 4294901760, %v54_v7  ;;  %v1156_v11 = vand.u32 4294901760, %v53_v8  ;;  %v51_v13 = vld [vmem:[#allocation5 + $0x48] sm:$0xff]  ;;  %v50_v14 = vld [vmem:[#allocation5 + $0x40] sm:$0xff] }
  0x1d   :  { %v1158_v12 = vand.u32 4294901760, %v52_v9  ;;  %827 = vmatpush3.msra.mxu0 %v1148_v4  ;;  %v1162_v15 = vsub.f32 %v57_v1, %v1148_v4  ;;  %v1165_v16 = vsub.f32 %v56_v2, %v1150_v5  ;;  %v1167_v17 = vand.u32 4294901760, %v51_v13  ;;  %v49_v19 = vld [vmem:[#allocation5 + $0x38] sm:$0xff]  ;;  %v48_v26 = vld [vmem:[#allocation5 + $0x30] sm:$0xff]  ;;  %v47_v36 = vld [vmem:[#allocation5 + $0x28] sm:$0xff]  ;;  %s713_s25 = sshll.u32 %s1115_s24, 4  ;;  %s714_s25 = int_to_ptr.vmem [resolvable:$true] %s713_s25 }
  0x1e   :  { %v1170_v18 = vsub.f32 %v55_v3, %v1152_v6  ;;  %828 = vmatprep.subr.mxu0 %v1113_v0  ;;  %v1174_v20 = vsub.f32 %v54_v7, %v1154_v10  ;;  %v1177_v21 = vsub.f32 %v53_v8, %v1156_v11  ;;  %v1183_v25 = vand.u32 4294901760, %v50_v14  ;;  %v46_v41 = vld [vmem:[#allocation5 + $0x20] sm:$0xff]  ;;  %v45_v49 = vld [vmem:[#allocation5 + $0x18] sm:$0xff]  ;;  %v44_v54 = vld [vmem:[#allocation5 + $0x10] sm:$0xff]  ;;  %s1083_s26 = scalar_lea.vmem %s714_s25, 128  ;;  %p1088_p11 = scmp.lt.s32.totalorder %s714_s25, %s714_s25 }
  0x1f   :  { %829 = vmatpush3.msra.mxu0 %v1150_v5  ;;  %v159_v22 = vand.u32 4294901760, %v1162_v15  ;;  %v166_v23 = vand.u32 4294901760, %v1165_v16  ;;  %v1187_v28 = vand.u32 4294901760, %v49_v19  ;;  %v1191_v30 = vsub.f32 %v52_v9, %v1158_v12  ;;  %v41_v50 = vld [vmem:[#allocation2] sm:$0xff]  ;;  %v43_v60 = vld [vmem:[#allocation5 + $0x8] sm:$0xff]  ;;  %v42_v7 = vld [vmem:[#allocation5] sm:$0xff]  ;;  %p1084_p10 = scmp.ne.s32.totalorder %s714_s25, %s1083_s26  ;;  %p1089_p12 = scmp.lt.s32.totalorder %s1083_s26, %s1083_s26 }
  0x20   :  { %v173_v24 = vand.u32 4294901760, %v1170_v18  ;;  %830 = vmatprep.subr.mxu0 %v1113_v0  ;;  %v180_v27 = vand.u32 4294901760, %v1174_v20  ;;  %v187_v29 = vand.u32 4294901760, %v1177_v21  ;;  %v1204_v34 = vsub.f32 %v51_v13, %v1167_v17 }
  0x21   :  { %831 = vmatpush3.msra.mxu0 %v1152_v6  ;;  %v160_v31 = vsub.f32 %v1162_v15, %v159_v22  ;;  %v167_v32 = vsub.f32 %v1165_v16, %v166_v23  ;;  %v1207_v35 = vand.u32 4294901760, %v48_v26  ;;  %v194_v40 = vand.u32 4294901760, %v1191_v30  ;;  %p1090_p13 = por %p1089_p12, %p1088_p11 }
  0x22   :  { %v174_v33 = vsub.f32 %v1170_v18, %v173_v24  ;;  %832 = vmatprep.subr.mxu0 %v1113_v0  ;;  %v181_v39 = vsub.f32 %v1174_v20, %v180_v27  ;;  %v188_v42 = vsub.f32 %v1177_v21, %v187_v29  ;;  %v1219_v43 = vsub.f32 %v50_v14, %v1183_v25 }
  0x23   :  { %833 = vmatpush3.msra.mxu0 %v1154_v10  ;;  %v161_v37 = vand.u32 4294901760, %v160_v31  ;;  %v168_v38 = vand.u32 4294901760, %v167_v32  ;;  %v1222_v45 = vand.u32 4294901760, %v47_v36  ;;  %v201_v46 = vand.u32 4294901760, %v1204_v34  ;;  %p1091_p0 = pnand %p1090_p13, %p1084_p10 }
  0x24   :  { %834 = vmatprep.subr.mxu0 %v1113_v0  ;;  %v175_v44 = vand.u32 4294901760, %v174_v33  ;;  %v1226_v47 = vsub.f32 %v49_v19, %v1187_v28  ;;  %v1230_v48 = vand.u32 4294901760, %v46_v41  ;;  %v182_v51 = vand.u32 4294901760, %v181_v39 }
  0x25   :  { %835 = vmatpush3.msra.mxu0 %v1156_v11  ;;  %862 = vmatpush3.msra.mxu1 %v161_v37  ;;  %v195_v52 = vsub.f32 %v1191_v30, %v194_v40  ;;  %v208_v53 = vand.u32 4294901760, %v1219_v43  ;;  %v1238_v55 = vsub.f32 %v48_v26, %v1207_v35  ;;  %v189_v56 = vand.u32 4294901760, %v188_v42 }
  0x26   :  { %836 = vmatprep.subr.mxu0 %v1113_v0  ;;  %863 = vmatprep.subr.mxu1 %v1113_v0  ;;  %v215_v57 = vand.u32 4294901760, %v1226_v47  ;;  %v202_v58 = vsub.f32 %v1204_v34, %v201_v46  ;;  %v1247_v59 = vand.u32 4294901760, %v45_v49  ;;  %v1250_v61 = vsub.f32 %v47_v36, %v1222_v45 }
  0x27   :  { %837 = vmatpush3.msra.mxu0 %v1158_v12  ;;  %864 = vmatpush3.msra.mxu1 %v168_v38  ;;  %v1252_v62 = vand.u32 4294901760, %v41_v50  ;;  %v1256_v63 = vand.u32 4294901760, %v44_v54  ;;  %v196_v1 = vand.u32 4294901760, %v195_v52  ;;  %v209_v2 = vsub.f32 %v1219_v43, %v208_v53 }
  0x28   :  { %838 = vmatprep.subr.mxu0 %v1113_v0  ;;  %865 = vmatprep.subr.mxu1 %v1113_v0  ;;  %v222_v3 = vand.u32 4294901760, %v1238_v55  ;;  %v1264_v8 = vsub.f32 %v46_v41, %v1230_v48  ;;  %v216_v9 = vsub.f32 %v1226_v47, %v215_v57  ;;  %v1271_v13 = vand.u32 4294901760, %v43_v60 }
  0x29   :  { %839 = vmatpush3.msra.mxu0 %v1167_v17  ;;  %866 = vmatpush3.msra.mxu1 %v175_v44  ;;  %v203_v14 = vand.u32 4294901760, %v202_v58  ;;  %v229_v19 = vand.u32 4294901760, %v1250_v61  ;;  %v1276_v26 = vsub.f32 %v41_v50, %v1252_v62  ;;  %v1279_v31 = vsub.f32 %v45_v49, %v1247_v59 }
  0x2a   :  { %840 = vmatprep.subr.mxu0 %v1113_v0  ;;  %867 = vmatprep.subr.mxu1 %v1113_v0  ;;  %v1283_v32 = vand.u32 4294901760, %v42_v7  ;;  %v210_v33 = vand.u32 4294901760, %v209_v2  ;;  %v223_v36 = vsub.f32 %v1238_v55, %v222_v3  ;;  %v236_v37 = vand.u32 4294901760, %v1264_v8 }
  0x2b   :  { %841 = vmatpush3.msra.mxu0 %v1183_v25  ;;  %868 = vmatpush3.msra.mxu1 %v182_v51  ;;  %v1291_v38 = vsub.f32 %v44_v54, %v1256_v63  ;;  %v217_v39 = vand.u32 4294901760, %v216_v9  ;;  %v230_v41 = vsub.f32 %v1250_v61, %v229_v19  ;;  %v148_v42 = vand.u32 4294901760, %v1276_v26 }
  0x2c   :  { %842 = vmatprep.subr.mxu0 %v1113_v0  ;;  %869 = vmatprep.subr.mxu1 %v1113_v0  ;;  %v243_v44 = vand.u32 4294901760, %v1279_v31  ;;  %v1302_v49 = vsub.f32 %v43_v60, %v1271_v13  ;;  %v224_v50 = vand.u32 4294901760, %v223_v36  ;;  %v237_v51 = vsub.f32 %v1264_v8, %v236_v37 }
  0x2d   :  { %843 = vmatpush3.msra.mxu0 %v1187_v28  ;;  %870 = vmatpush3.msra.mxu1 %v189_v56  ;;  %v250_v52 = vand.u32 4294901760, %v1291_v38  ;;  %v1312_v54 = vsub.f32 %v42_v7, %v1283_v32  ;;  %v231_v56 = vand.u32 4294901760, %v230_v41  ;;  %v149_v58 = vsub.f32 %v1276_v26, %v148_v42 }
  0x2e   :  { %844 = vmatprep.subr.mxu0 %v1113_v0  ;;  %871 = vmatprep.subr.mxu1 %v1113_v0  ;;  %v244_v60 = vsub.f32 %v1279_v31, %v243_v44  ;;  %v238_v2 = vand.u32 4294901760, %v237_v51 }
  0x2f   :  { %845 = vmatpush3.msra.mxu0 %v1207_v35  ;;  %872 = vmatpush3.msra.mxu1 %v196_v1  ;;  %v257_v1 = vand.u32 4294901760, %v1302_v49  ;;  %v251_v7 = vsub.f32 %v1291_v38, %v250_v52  ;;  %v264_v9 = vand.u32 4294901760, %v1312_v54 }
  0x30   :  { %846 = vmatprep.subr.mxu0 %v1113_v0  ;;  %873 = vmatprep.subr.mxu1 %v1113_v0 }
  0x31   :  { %847 = vmatpush3.msra.mxu0 %v1222_v45  ;;  %874 = vmatpush3.msra.mxu1 %v203_v14  ;;  %v150_v14 = vand.u32 4294901760, %v149_v58  ;;  %v258_v36 = vsub.f32 %v1302_v49, %v257_v1  ;;  %v265_v41 = vsub.f32 %v1312_v54, %v264_v9 }
  0x32   :  { %848 = vmatprep.subr.mxu0 %v1113_v0  ;;  %875 = vmatprep.subr.mxu1 %v1113_v0 }
  0x33   :  { %849 = vmatpush3.msra.mxu0 %v1230_v48  ;;  %876 = vmatpush3.msra.mxu1 %v210_v33  ;;  %v245_v33 = vand.u32 4294901760, %v244_v60  ;;  %v266_v51 = vand.u32 4294901760, %v265_v41 }
  0x34   :  { %850 = vmatprep.subr.mxu0 %v1113_v0  ;;  %877 = vmatprep.subr.mxu1 %v1113_v0 }
  0x35   :  { %851 = vmatpush3.msra.mxu0 %v1247_v59  ;;  %878 = vmatpush3.msra.mxu1 %v217_v39  ;;  %v252_v39 = vand.u32 4294901760, %v251_v7 }
  0x36   :  { %852 = vmatprep.subr.mxu0 %v1113_v0  ;;  %879 = vmatprep.subr.mxu1 %v1113_v0 }
  0x37   :  { %853 = vmatpush3.msra.mxu0 %v1256_v63  ;;  %880 = vmatpush3.msra.mxu1 %v224_v50  ;;  %v259_v50 = vand.u32 4294901760, %v258_v36 }
  0x38   :  { %854 = vmatprep.subr.mxu0 %v1113_v0  ;;  %881 = vmatprep.subr.mxu1 %v1113_v0 }
  0x39   :  { %855 = vmatpush3.msra.mxu0 %v1271_v13  ;;  %882 = vmatpush3.msra.mxu1 %v231_v56 }
  0x3a   :  { %856 = vmatprep.subr.mxu0 %v1113_v0  ;;  %883 = vmatprep.subr.mxu1 %v1113_v0 }
  0x3b   :  { %857 = vmatpush3.msra.mxu0 %v1283_v32  ;;  %884 = vmatpush3.msra.mxu1 %v238_v2 }
  0x3c   :  { %885 = vmatprep.subr.mxu1 %v1113_v0  ;;  %896 = vmatprep.subr.mxu0 %v1113_v0 }
  0x3d   :  { %859 = vmatmul.mubr.f32.vlgmr.msra.gmra.mxu0 %v150_v14  ;;  %886 = vmatpush3.msra.mxu1 %v245_v33 }
  0x3e   :  { %897 = vmatpush3.msra.mxu0 %v1162_v15  ;;  %887 = vmatprep.subr.mxu1 %v1113_v0 }
  0x3f   :  { %898 = vmatprep.subr.mxu0 %v1113_v0  ;;  %888 = vmatpush3.msra.mxu1 %v252_v39 }
  0x40   :  { %899 = vmatpush3.msra.mxu0 %v1165_v16  ;;  %889 = vmatprep.subr.mxu1 %v1113_v0 }
  0x41   :  { %900 = vmatprep.subr.mxu0 %v1113_v0  ;;  %890 = vmatpush3.msra.mxu1 %v259_v50 }
  0x42   :  { %901 = vmatpush3.msra.mxu0 %v1170_v18  ;;  %891 = vmatprep.subr.mxu1 %v1113_v0 }
  0x43   :  { %902 = vmatprep.subr.mxu0 %v1113_v0  ;;  %892 = vmatpush3.msra.mxu1 %v266_v51 }
  0x44   :  { %903 = vmatpush3.msra.mxu0 %v1174_v20  ;;  %894 = vmatmul.mubr.f32.vlgmr.msra.gmra.mxu1 %v1252_v62 }
  0x45   :  { %904 = vmatprep.subr.mxu0 %v1113_v0  ;;  %931 = vmatprep.subr.mxu1 %v1113_v0 }
  0x46   :  { %905 = vmatpush3.msra.mxu0 %v1177_v21  ;;  %932 = vmatpush3.msra.mxu1 %v1148_v4 }
  0x47   :  { %906 = vmatprep.subr.mxu0 %v1113_v0  ;;  %933 = vmatprep.subr.mxu1 %v1113_v0 }
  0x48   :  { %907 = vmatpush3.msra.mxu0 %v1191_v30  ;;  %934 = vmatpush3.msra.mxu1 %v1150_v5 }
  0x49   :  { %908 = vmatprep.subr.mxu0 %v1113_v0  ;;  %935 = vmatprep.subr.mxu1 %v1113_v0 }
  0x4a   :  { %909 = vmatpush3.msra.mxu0 %v1204_v34  ;;  %936 = vmatpush3.msra.mxu1 %v1152_v6 }
  0x4b   :  { %910 = vmatprep.subr.mxu0 %v1113_v0  ;;  %937 = vmatprep.subr.mxu1 %v1113_v0 }
  0x4c   :  { %911 = vmatpush3.msra.mxu0 %v1219_v43  ;;  %938 = vmatpush3.msra.mxu1 %v1154_v10 }
  0x4d   :  { %912 = vmatprep.subr.mxu0 %v1113_v0  ;;  %939 = vmatprep.subr.mxu1 %v1113_v0 }
  0x4e   :  { %913 = vmatpush3.msra.mxu0 %v1226_v47  ;;  %940 = vmatpush3.msra.mxu1 %v1156_v11 }
  0x4f   :  { %914 = vmatprep.subr.mxu0 %v1113_v0  ;;  %941 = vmatprep.subr.mxu1 %v1113_v0 }
  0x50   :  { %915 = vmatpush3.msra.mxu0 %v1238_v55  ;;  %942 = vmatpush3.msra.mxu1 %v1158_v12 }
  0x51   :  { %916 = vmatprep.subr.mxu0 %v1113_v0  ;;  %943 = vmatprep.subr.mxu1 %v1113_v0 }
  0x52   :  { %917 = vmatpush3.msra.mxu0 %v1250_v61  ;;  %944 = vmatpush3.msra.mxu1 %v1167_v17 }
  0x53   :  { %918 = vmatprep.subr.mxu0 %v1113_v0  ;;  %945 = vmatprep.subr.mxu1 %v1113_v0 }
  0x54   :  { %919 = vmatpush3.msra.mxu0 %v1264_v8  ;;  %946 = vmatpush3.msra.mxu1 %v1183_v25 }
  0x55   :  { %920 = vmatprep.subr.mxu0 %v1113_v0  ;;  %947 = vmatprep.subr.mxu1 %v1113_v0 }
  0x56   :  { %921 = vmatpush3.msra.mxu0 %v1279_v31  ;;  %948 = vmatpush3.msra.mxu1 %v1187_v28 }
  0x57   :  { %922 = vmatprep.subr.mxu0 %v1113_v0  ;;  %949 = vmatprep.subr.mxu1 %v1113_v0 }
  0x58   :  { %923 = vmatpush3.msra.mxu0 %v1291_v38  ;;  %950 = vmatpush3.msra.mxu1 %v1207_v35 }
  0x59   :  { %924 = vmatprep.subr.mxu0 %v1113_v0  ;;  %951 = vmatprep.subr.mxu1 %v1113_v0 }
  0x5a   :  { %925 = vmatpush3.msra.mxu0 %v1302_v49  ;;  %952 = vmatpush3.msra.mxu1 %v1222_v45 }
  0x5b   :  { %926 = vmatprep.subr.mxu0 %v1113_v0  ;;  %953 = vmatprep.subr.mxu1 %v1113_v0 }
  0x5c   :  { %927 = vmatpush3.msra.mxu0 %v1312_v54  ;;  %928 = vmatprep.mubr.msk.f32.mxu0 %vm1114_vm0, %v1113_v0 }
  0x5d   :  { %954 = vmatpush3.msra.mxu1 %v1230_v48  ;;  %929 = vmatmul.mubr.f32.vlgmr.msra.gmra.mxu0 %v1276_v26 }
  0x5e   :  { %955 = vmatprep.subr.mxu1 %v1113_v0  ;;  %966 = vmatprep.subr.mxu0 %v1113_v0 }
  0x5f   :  { %956 = vmatpush3.msra.mxu1 %v1247_v59  ;;  %967 = vmatpush3.msra.mxu0 %v159_v22 }
  0x60   :  { %957 = vmatprep.subr.mxu1 %v1113_v0  ;;  %968 = vmatprep.subr.mxu0 %v1113_v0 }
  0x61   :  { %958 = vmatpush3.msra.mxu1 %v1256_v63  ;;  %969 = vmatpush3.msra.mxu0 %v166_v23 }
  0x62   :  { %959 = vmatprep.subr.mxu1 %v1113_v0  ;;  %970 = vmatprep.subr.mxu0 %v1113_v0 }
  0x63   :  { %960 = vmatpush3.msra.mxu1 %v1271_v13  ;;  %971 = vmatpush3.msra.mxu0 %v173_v24 }
  0x64   :  { %961 = vmatprep.subr.mxu1 %v1113_v0  ;;  %972 = vmatprep.subr.mxu0 %v1113_v0 }
  0x65   :  { %962 = vmatpush3.msra.mxu1 %v1283_v32  ;;  %963 = vmatprep.mubr.msk.f32.mxu1 %vm1114_vm0, %v1113_v0 }
  0x66   :  { %973 = vmatpush3.msra.mxu0 %v180_v27  ;;  %964 = vmatmul.mubr.f32.vlgmr.msra.gmra.mxu1 %v148_v42 }
  0x67   :  { %974 = vmatprep.subr.mxu0 %v1113_v0  ;;  %1001 = vmatprep.subr.mxu1 %v1113_v0 }
  0x68   :  { %975 = vmatpush3.msra.mxu0 %v187_v29  ;;  %1002 = vmatpush3.msra.mxu1 %v1148_v4 }
  0x69   :  { %976 = vmatprep.subr.mxu0 %v1113_v0  ;;  %1003 = vmatprep.subr.mxu1 %v1113_v0 }
  0x6a   :  { %977 = vmatpush3.msra.mxu0 %v194_v40  ;;  %1004 = vmatpush3.msra.mxu1 %v1150_v5 }
  0x6b   :  { %978 = vmatprep.subr.mxu0 %v1113_v0  ;;  %1005 = vmatprep.subr.mxu1 %v1113_v0 }
  0x6c   :  { %979 = vmatpush3.msra.mxu0 %v201_v46  ;;  %1006 = vmatpush3.msra.mxu1 %v1152_v6 }
  0x6d   :  { %980 = vmatprep.subr.mxu0 %v1113_v0  ;;  %1007 = vmatprep.subr.mxu1 %v1113_v0 }
  0x6e   :  { %981 = vmatpush3.msra.mxu0 %v208_v53  ;;  %1008 = vmatpush3.msra.mxu1 %v1154_v10 }
  0x6f   :  { %982 = vmatprep.subr.mxu0 %v1113_v0  ;;  %1009 = vmatprep.subr.mxu1 %v1113_v0 }
  0x70   :  { %983 = vmatpush3.msra.mxu0 %v215_v57  ;;  %1010 = vmatpush3.msra.mxu1 %v1156_v11 }
  0x71   :  { %984 = vmatprep.subr.mxu0 %v1113_v0  ;;  %1011 = vmatprep.subr.mxu1 %v1113_v0 }
  0x72   :  { %985 = vmatpush3.msra.mxu0 %v222_v3  ;;  %1012 = vmatpush3.msra.mxu1 %v1158_v12 }
  0x73   :  { %986 = vmatprep.subr.mxu0 %v1113_v0  ;;  %1013 = vmatprep.subr.mxu1 %v1113_v0 }
  0x74   :  { %987 = vmatpush3.msra.mxu0 %v229_v19  ;;  %1014 = vmatpush3.msra.mxu1 %v1167_v17  ;;  %v723_v17 = vld [vmem:[%s1513_s2] ss:$0 sm:$0xff] }
  0x75   :  { %988 = vmatprep.subr.mxu0 %v1113_v0  ;;  %1015 = vmatprep.subr.mxu1 %v1113_v0 }
  0x76   :  { %989 = vmatpush3.msra.mxu0 %v236_v37  ;;  %1016 = vmatpush3.msra.mxu1 %v1183_v25 }
  0x77   :  { %990 = vmatprep.subr.mxu0 %v1113_v0  ;;  %1017 = vmatprep.subr.mxu1 %v1113_v0 }
  0x78   :  { %991 = vmatpush3.msra.mxu0 %v243_v44  ;;  %1018 = vmatpush3.msra.mxu1 %v1187_v28 }
  0x79   :  { %992 = vmatprep.subr.mxu0 %v1113_v0  ;;  %1019 = vmatprep.subr.mxu1 %v1113_v0 }
  0x7a   :  { %993 = vmatpush3.msra.mxu0 %v250_v52  ;;  %1020 = vmatpush3.msra.mxu1 %v1207_v35 }
  0x7b   :  { %994 = vmatprep.subr.mxu0 %v1113_v0  ;;  %1021 = vmatprep.subr.mxu1 %v1113_v0 }
  0x7c   :  { %995 = vmatpush3.msra.mxu0 %v257_v1  ;;  %1022 = vmatpush3.msra.mxu1 %v1222_v45 }
  0x7d   :  { %996 = vmatprep.subr.mxu0 %v1113_v0  ;;  %1023 = vmatprep.subr.mxu1 %v1113_v0 }
  0x7e   :  { %997 = vmatpush3.msra.mxu0 %v264_v9  ;;  %998 = vmatprep.mubr.msk.f32.mxu0 %vm1114_vm0, %v1113_v0 }
  0x7f   :  { %1024 = vmatpush3.msra.mxu1 %v1230_v48  ;;  %999 = vmatmul.mubr.f32.vlgmr.msra.gmra.mxu0 %v1252_v62 }
  0x80   :  { %1025 = vmatprep.subr.mxu1 %v1113_v0  ;;  %1033 = vmatprep.mubr.msk.f32.mxu1 %vm1114_vm0, %v1113_v0 }
  0x81   :  { %1026 = vmatpush3.msra.mxu1 %v1247_v59 }
  0x82   :  { %1027 = vmatprep.subr.mxu1 %v1113_v0 }
  0x83   :  { %1028 = vmatpush3.msra.mxu1 %v1256_v63 }
  0x84   :  { %1029 = vmatprep.subr.mxu1 %v1113_v0 }
  0x85   :  { %1030 = vmatpush3.msra.mxu1 %v1271_v13 }
  0x86   :  { %1031 = vmatprep.subr.mxu1 %v1113_v0 }
  0x87   :  { %1032 = vmatpush3.msra.mxu1 %v1283_v32 }
  0x88   :  { %1034 = vmatmul.mubr.f32.vlgmr.msra.gmra.mxu1 %v1252_v62 }
  0xfd   :  { %v152_v4 = vpop.f32.mrf.mxu0 }
  0xfe   :  { %v153_v18 = vadd.f32 %v723_v17, %v152_v4 }
  0xff   :  { %v860_v5 = vpop.f32.mrf.mxu0 }
 0x104   :  { %v303_v6 = vpop.f32.mrf.mxu1 }
 0x105   :  { %v304_v21 = vadd.f32 %v303_v6, %v153_v18 }
 0x106   :  { %v895_v10 = vpop.f32.mrf.mxu1 }
 0x11d   :  { %v407_v11 = vpop.f32.mrf.mxu0 }
 0x11e   :  { %v408_v22 = vadd.f32 %v407_v11, %v304_v21 }
 0x11f   :  { %v930_v12 = vpop.f32.mrf.mxu0 }
 0x126   :  { %v496_v15 = vpop.f32.mrf.mxu1 }
 0x127   :  { %v497_v23 = vadd.f32 %v496_v15, %v408_v22 }
 0x128   :  { %v965_v16 = vpop.f32.mrf.mxu1 }
 0x13f   :  { %v615_v20 = vpop.f32.mrf.mxu0 }
 0x140   :  { %v616_v24 = vadd.f32 %v615_v20, %v497_v23 }
 0x141   :  { %v1000_v0 = vpop.f32.mrf.mxu0 }
 0x148   :  { %v702_v25 = vpop.f32.mrf.mxu1 }
 0x149   :  { %v703_v27 = vadd.f32 %v702_v25, %v616_v24 }
 0x14a   :  { %v1035_v28 = vpop.f32.mrf.mxu1 }
 0x14b   :  { %706 = vst [vmem:[#allocation7] sm:$0xff] %v703_v27 }
 0x14c   :  { %1094 = shalt.err (!%p1091_p0)
}
 0x14d   :  { %716 = dma.vmem_to_hbm [thread:$0]  %s714_s25, 128, %s1514_s3, [#allocation4]  }
 0x14e   :  { %1107 = dma.done.wait [#allocation4], 128  }
 0x14f   :  { %1108 = vsyncadd [#allocation4], 4294967168 }
 0x150   :  { %720 = vsyncpa [#allocation3], 1 }
 0x151   :  { %721 = vsyncpa [#allocation6], 1 }
 0x152   :  { %722 = vsyncpa [#allocation4], 1 }

</bundles_post_ra>
